<compile_context>
chip_gen: v6e
topology: v6e:2x2x1
jax: 0.10.0
libtpu: 0.0.40
codegen_flags: <defaults>
</compile_context>

<pallas_src>
import jax
import jax.numpy as jnp
from jax.experimental import pallas as pl
from jax.experimental.pallas import tpu as pltpu

LANE = 128      # lane width (last-dim tile)
SUBLANE = 8     # sublane width (second-to-last-dim tile)


def _round_up(n, m):
    return ((n + m - 1) // m) * m


def decoder_kernel(x_ref, w1_ref, b1_ref, w2_ref, b2_ref, o_ref):
    # merge_layer: x @ W1 + b1. Cast x to the weight dtype so bf16 weights hit
    # the fast bf16 MXU path on BOTH matmuls; accumulation stays f32.
    h = jnp.dot(x_ref[...].astype(w1_ref.dtype), w1_ref[...],
                preferred_element_type=jnp.float32)
    h = h + b1_ref[...]                          # (TB, Lp) + (1, Lp) broadcast
    # LeakyReLU(negative_slope=0.1)
    h = jnp.where(h >= 0, h, 0.1 * h)
    # fc: h @ W2 + b2
    out = jnp.dot(h.astype(w2_ref.dtype), w2_ref[...],
                  preferred_element_type=jnp.float32)
    out = out + b2_ref[...]                      # (TB, latent) + (1, latent)
    o_ref[...] = out.astype(o_ref.dtype)


def prepare_decoder_params(w1, b1, w2, b2):
    """Zero-pad the hidden dim (w1 cols, b1, w2 rows) up to a multiple of 128.
    Call ONCE at init so the pads are not re-executed on every forward call.
    The padding is mathematically inert: padded h columns are LeakyReLU(0)=0
    and the matching zero rows of w2 contribute nothing to the output."""
    latent = w1.shape[1]
    Lp = _round_up(latent, LANE)
    if Lp != latent:
        pad = Lp - latent
        w1 = jnp.pad(w1, ((0, 0), (0, pad)))
        b1 = jnp.pad(b1, ((0, 0), (0, pad)))
        w2 = jnp.pad(w2, ((0, pad), (0, 0)))
    return w1, b1, w2, b2


def decoder_forward(x, w1, b1, w2, b2, *, block_b=512):
    """x: (B, input_dim); w1: (input_dim, Lp); b1: (1, Lp); w2: (Lp, latent);
    b2: (1, latent), where Lp = hidden dim padded to a 128 multiple (see
    prepare_decoder_params). Returns (B, latent)."""
    B, input_dim = x.shape

    # Convenience: accept un-prepared params (pads per call). Prefer calling
    # prepare_decoder_params once at init so this is free.
    if w1.shape[1] % LANE != 0:
        w1, b1, w2, b2 = prepare_decoder_params(w1, b1, w2, b2)

    Lp = w1.shape[1]
    latent = w2.shape[1]
    assert b1.shape == (1, Lp) and w2.shape[0] == Lp and b2.shape == (1, latent)

    # Batch tile: large default (512) to amortize per-grid-step overhead, but
    # capped so there are >= 2 grid steps so v7x can shard the "parallel" batch
    # axis across its 2 TensorCores (neutral on v5e/v6e).
    TB = block_b
    if B <= TB:
        TB = max(SUBLANE, _round_up(pl.cdiv(B, 2), SUBLANE))
    TB = min(TB, _round_up(B, SUBLANE))
    # Final partial batch block is masked by Pallas -> no x padding, no out slice.
    grid = (pl.cdiv(B, TB),)

    # Grid-invariant (resident) operands: constant index_map + single-buffered.
    def _resident(shape):
        return pl.BlockSpec(shape, lambda i: (0, 0), pipeline_mode=pl.Buffered(1))

    # VMEM budget: double-buffered x/out tiles + single-buffered resident weights.
    itemsize = x.dtype.itemsize
    est_bytes = (2 * TB * input_dim * itemsize
                 + 2 * TB * latent * itemsize
                 + (w1.size + b1.size) * w1.dtype.itemsize
                 + (w2.size + b2.size) * w2.dtype.itemsize)
    vmem_limit_bytes = int(min(max(2 * est_bytes, 32 << 20), 64 << 20))
    # TODO(synk): if latent grows past ~2K in f32 (resident w2 alone > ~16 MiB),
    # add an N-tiling grid axis over w2 columns instead of keeping it resident.

    return pl.pallas_call(
        decoder_kernel,
        out_shape=jax.ShapeDtypeStruct((B, latent), x.dtype),
        grid=grid,
        in_specs=[
            pl.BlockSpec((TB, input_dim), lambda i: (i, 0)),   # x: batch-tiled
            _resident((input_dim, Lp)),                        # w1: VMEM-resident
            _resident((1, Lp)),                                # b1
            _resident((Lp, latent)),                           # w2
            _resident((1, latent)),                            # b2
        ],
        out_specs=pl.BlockSpec((TB, latent), lambda i: (i, 0)),
        compiler_params=pltpu.CompilerParams(
            dimension_semantics=("parallel",),                 # v7x: 2 TCs
            vmem_limit_bytes=vmem_limit_bytes),
    )(x, w1, b1, w2, b2)


def init_params(key, input_dim, latent_dim, dtype=jnp.float32):
    """Deterministic init mimicking torch.nn.Linear default (uniform +/- 1/sqrt(fan_in)).
    Weights are returned already transposed to [in, out] (UN-padded).
    Pass dtype=jnp.bfloat16 for bf16 MXU operands (loosen tolerances)."""
    k1, k2, k3, k4 = jax.random.split(key, 4)
    bound1 = 1.0 / (input_dim ** 0.5)
    bound2 = 1.0 / (latent_dim ** 0.5)
    w1 = jax.random.uniform(k1, (input_dim, latent_dim), dtype, -bound1, bound1)
    b1 = jax.random.uniform(k2, (1, latent_dim), dtype, -bound1, bound1)
    w2 = jax.random.uniform(k3, (latent_dim, latent_dim), dtype, -bound2, bound2)
    b2 = jax.random.uniform(k4, (1, latent_dim), dtype, -bound2, bound2)
    return w1, b1, w2, b2


def decoder_reference(x, w1, b1, w2, b2):
    h = x @ w1 + b1
    h = jnp.where(h >= 0, h, 0.1 * h)
    return h @ w2 + b2


if __name__ == "__main__":
    key = jax.random.PRNGKey(0)
    kx, kp = jax.random.split(key)

    # Small demo shapes: exercise the partial batch block (20 % TB != 0), the
    # hidden-dim lane padding (32 -> 128), and the native-latent output path.
    batch = 20
    input_dim = 48
    latent_dim = 32

    x = jax.random.normal(kx, (batch, input_dim), jnp.float32)
    w1, b1, w2, b2 = init_params(kp, input_dim, latent_dim)

    # Pad the hidden dim once at init (not per forward call).
    w1p, b1p, w2p, b2p = prepare_decoder_params(w1, b1, w2, b2)

    out = decoder_forward(x, w1p, b1p, w2p, b2p)
    out = jax.block_until_ready(out)

    ref = decoder_reference(x, w1, b1, w2, b2)
    assert out.shape == (batch, latent_dim)
    assert jnp.allclose(out, ref, atol=1e-4, rtol=1e-4)

    print("KERNEL_OK")
</pallas_src>

<mosaic_0001>
module attributes {stable_mosaic.version = 11 : i64} {
  func.func @decoder_kernel(%arg0: i32, %arg1: memref<16x48xf32, #tpu.memory_space<vmem>>, %arg2: memref<48x128xf32, #tpu.memory_space<vmem>>, %arg3: memref<1x128xf32, #tpu.memory_space<vmem>>, %arg4: memref<128x32xf32, #tpu.memory_space<vmem>>, %arg5: memref<1x32xf32, #tpu.memory_space<vmem>>, %arg6: memref<16x32xf32, #tpu.memory_space<vmem>>) attributes {dimension_semantics = [#tpu.dimension_semantics<parallel>], iteration_bounds = array<i64: 2>, scalar_prefetch = 0 : i64, scratch_operands = 0 : i64, tpu.core_type = #tpu.core_type<tc>, window_params = [{transform_indices = @transform_0, window_bounds = array<i64: 16, 48>}, {pipeline_mode = #tpu.pipeline_mode<synchronous>, transform_indices = @transform_1, window_bounds = array<i64: 48, 128>}, {pipeline_mode = #tpu.pipeline_mode<synchronous>, transform_indices = @transform_2, window_bounds = array<i64: 1, 128>}, {pipeline_mode = #tpu.pipeline_mode<synchronous>, transform_indices = @transform_3, window_bounds = array<i64: 128, 32>}, {pipeline_mode = #tpu.pipeline_mode<synchronous>, transform_indices = @transform_4, window_bounds = array<i64: 1, 32>}, {transform_indices = @transform_5, window_bounds = array<i64: 16, 32>}]} {
    %c0 = arith.constant 0 : index
    %c0_0 = arith.constant 0 : index
    %0 = vector.load %arg1[%c0, %c0_0] : memref<16x48xf32, #tpu.memory_space<vmem>>, vector<16x48xf32>
    %c0_1 = arith.constant 0 : index
    %c0_2 = arith.constant 0 : index
    %1 = vector.load %arg2[%c0_1, %c0_2] : memref<48x128xf32, #tpu.memory_space<vmem>>, vector<48x128xf32>
    %cst = arith.constant dense<0.000000e+00> : vector<16x128xf32>
    %2 = tpu.matmul %0, %1, %cst {dimension_numbers = #tpu.dot_dimension_numbers<[1], [0], [0], [1], [0, 0, 1, 1], [], []>} : vector<16x48xf32>, vector<48x128xf32>, vector<16x128xf32> -> vector<16x128xf32>
    %c0_3 = arith.constant 0 : index
    %c0_4 = arith.constant 0 : index
    %3 = vector.load %arg3[%c0_3, %c0_4] : memref<1x128xf32, #tpu.memory_space<vmem>>, vector<1x128xf32>
    %4 = vector.broadcast %3 : vector<1x128xf32> to vector<16x128xf32>
    %5 = arith.addf %2, %4 : vector<16x128xf32>
    %cst_5 = arith.constant 0.000000e+00 : f32
    %6 = vector.broadcast %cst_5 : f32 to vector<16x128xf32>
    %7 = arith.cmpf oge, %5, %6 : vector<16x128xf32>
    %cst_6 = arith.constant 1.000000e-01 : f32
    %8 = vector.broadcast %cst_6 : f32 to vector<16x128xf32>
    %9 = arith.mulf %8, %5 : vector<16x128xf32>
    %10 = arith.select %7, %5, %9 : vector<16x128xi1>, vector<16x128xf32>
    %c0_7 = arith.constant 0 : index
    %c0_8 = arith.constant 0 : index
    %11 = vector.load %arg4[%c0_7, %c0_8] : memref<128x32xf32, #tpu.memory_space<vmem>>, vector<128x32xf32>
    %cst_9 = arith.constant dense<0.000000e+00> : vector<16x32xf32>
    %12 = tpu.matmul %10, %11, %cst_9 {dimension_numbers = #tpu.dot_dimension_numbers<[1], [0], [0], [1], [0, 0, 1, 1], [], []>} : vector<16x128xf32>, vector<128x32xf32>, vector<16x32xf32> -> vector<16x32xf32>
    %c0_10 = arith.constant 0 : index
    %c0_11 = arith.constant 0 : index
    %13 = vector.load %arg5[%c0_10, %c0_11] : memref<1x32xf32, #tpu.memory_space<vmem>>, vector<1x32xf32>
    %14 = vector.broadcast %13 : vector<1x32xf32> to vector<16x32xf32>
    %15 = arith.addf %12, %14 : vector<16x32xf32>
    %c0_12 = arith.constant 0 : index
    %c0_13 = arith.constant 0 : index
    %16 = vector.load %arg6[%c0_12, %c0_13] : memref<16x32xf32, #tpu.memory_space<vmem>>, vector<16x32xf32>
    tpu.vector_store %arg6[%c0_12, %c0_13], %15 {strides = array<i32>} : memref<16x32xf32, #tpu.memory_space<vmem>>, vector<16x32xf32>,
    return
  }
  func.func @transform_0(%arg0: i32) -> (i32, i32) {
    %c0_i32 = arith.constant 0 : i32
    %c0_i32_0 = arith.constant 0 : i32
    return %arg0, %c0_i32 : i32, i32
  }
  func.func @transform_1(%arg0: i32) -> (i32, i32) {
    %c0_i32 = arith.constant 0 : i32
    %c0_i32_0 = arith.constant 0 : i32
    %c0_i32_1 = arith.constant 0 : i32
    return %c0_i32, %c0_i32_0 : i32, i32
  }
  func.func @transform_2(%arg0: i32) -> (i32, i32) {
    %c0_i32 = arith.constant 0 : i32
    %c0_i32_0 = arith.constant 0 : i32
    %c0_i32_1 = arith.constant 0 : i32
    return %c0_i32, %c0_i32_0 : i32, i32
  }
  func.func @transform_3(%arg0: i32) -> (i32, i32) {
    %c0_i32 = arith.constant 0 : i32
    %c0_i32_0 = arith.constant 0 : i32
    %c0_i32_1 = arith.constant 0 : i32
    return %c0_i32, %c0_i32_0 : i32, i32
  }
  func.func @transform_4(%arg0: i32) -> (i32, i32) {
    %c0_i32 = arith.constant 0 : i32
    %c0_i32_0 = arith.constant 0 : i32
    %c0_i32_1 = arith.constant 0 : i32
    return %c0_i32, %c0_i32_0 : i32, i32
  }
  func.func @transform_5(%arg0: i32) -> (i32, i32) {
    %c0_i32 = arith.constant 0 : i32
    %c0_i32_0 = arith.constant 0 : i32
    return %arg0, %c0_i32 : i32, i32
  }
}

</mosaic_0001>

<bundles_post_ra>
// kernel: tpu_custom_call.1
= control target key start
LH: loop header
LB: loop body
LE: loop exit
PB: predicated region body
PF: predicated region fallthrough
CT: control target
= control target key end

     0   :  { %10 = vsyncpa [#allocation3], 0  ;;  %s958_s0 = inlined_call_operand.vmem [shape: f32[20,48], index: 0, kind: input, shape index: {}]   ;;  %s959_s1 = inlined_call_operand.vmem [shape: f32[48,128], index: 1, kind: input, shape index: {}]   ;;  %s960_s2 = inlined_call_operand.vmem [shape: f32[1,128], index: 2, kind: input, shape index: {}]   ;;  %s961_s3 = inlined_call_operand.vmem [shape: f32[128,32], index: 3, kind: input, shape index: {}]   ;;  %s962_s4 = inlined_call_operand.vmem [shape: f32[1,32], index: 4, kind: input, shape index: {}]   ;;  %s963_s5 = inlined_call_operand.hbm [shape: f32[20,32], index: 5, kind: output, shape index: {}]  }
   0x1   :  { %12 = vsyncpa [#allocation3 + $0x1], 0  ;;  %s768_s18 = smov 0   ;;  %s770_s19 = smov 0  }
   0x2   :  { %s772_s20 = smov 0   ;;  %s774_s21 = smov 0  }
   0x3 LB: > { %s789_s22 = sadd.s32 4294967295, %s733_s21   ;;  %s536_s23 = sadd.s32 4294967294, %s733_s21   ;;  %s733_s21 = sphi %s774_s21, %s969_s21   ;;  %s729_s20 = sphi %s772_s20, %s968_s20   ;;  %s725_s19 = sphi %s770_s19, %s967_s19   ;;  %s721_s18 = sphi %s768_s18, %s966_s18  }
   0x4   : > { %s793_s24 = sadd.s32 1, %s733_s21   ;;  %s135_s25 = sadd.s32 1, %s729_s20 }
   0x5   : > { %s132_s26 = ssub.s32 %s733_s21, %s793_s24  ;;  %p145_p0 = scmp.ne.s32.totalorder %s729_s20, %s725_s19 }
   0x6   : > { %p133_p1 = scmp.eq.s32.totalorder %s132_s26, 0  ;;  %p146_p2 = scmp.eq.s32.totalorder %s789_s22, 1 }
   0x7   : > { %p151_p3 = scmp.ne.s32.totalorder %s725_s19, %s721_s18  ;;  %p152_p4 = scmp.eq.s32.totalorder %s536_s23, 1 }
   0x8   : > { %s804_s27 = scalar_select %p133_p1, %s729_s20, %s135_s25  }
   0x9   : > { %p806_p5 = por %p146_p2, %p145_p0  ;;  %p810_p6 = por %p152_p4, %p151_p3 }
   0xa   : > { %p539_p7 = scmp.ge.s32.totalorder %s733_s21, 1  ;;  %p199_p8 = scmp.lt.s32.totalorder %s733_s21, 3 }
   0xc   : > { %p200_p9 = pnand %p539_p7, %p199_p8 }
   0xd   : > { %s823_s9 = sshll.u32 (!%p200_p9), %s789_s22, 1  ;;  %s228_s12 = sand.u32 (!%p200_p9), 1, %s725_s19  }
   0xe   : > { %203 = sbr.rel (%p200_p9) target bundleno = 458 (0x1ca), region = 40  ;;  %p236_p10 = scmp.lt.s32.totalorder (!%p200_p9), %s823_s9, 2 }
   0xf   : > { %s540_s13 = sshll.u32 (!%p200_p9), %s228_s12, 4  ;;  %s899_s17 = scalar_lea.sflag (!%p200_p9), [#allocation3], %s228_s12 }
  0x13   : > { %v257_v0 = vld [vmem:[%s959_s1 + $0x28] sm:$0xff]  ;;  %v256_v1 = vld [vmem:[%s959_s1 + $0x20] sm:$0xff]  ;;  %v255_v2 = vld [vmem:[%s959_s1 + $0x18] sm:$0xff]  ;;  %s237_s16 = scalar_select %p236_p10, %s823_s9, 2  ;;  %vm265_vm0 = vcmask 392192   ;;  %vm451_vm3 = vcmask 261120  }
  0x14   : > { %583 = vmatprep.subr.mxu0 %v257_v0  ;;  %v368_v3 = vld [vmem:[%s961_s3 + $0x78] sm:$0xff]  ;;  %v367_v4 = vld [vmem:[%s961_s3 + $0x70] sm:$0xff]  ;;  %v366_v6 = vld [vmem:[%s961_s3 + $0x68] sm:$0xff]  ;;  %s463_s23 = ssub.s32 (%p806_p5), 3, %s823_s9 }
  0x15   : > { %584 = vmatpush3.msra.mxu0 %v257_v0  ;;  %598 = vmatprep.subr.mxu1 %v368_v3  ;;  %v254_v5 = vld [vmem:[%s959_s1 + $0x10] sm:$0xff]  ;;  %s542_s30 = sshll.u32 %s237_s16, 3  ;;  %v253_v7 = vld [vmem:[%s959_s1 + $0x8] sm:$0xff]  ;;  %v365_v9 = vld [vmem:[%s961_s3 + $0x60] sm:$0xff]  ;;  %s230_s16 = scalar_lea.vmem [#allocation2], %s540_s13 }
  0x16   : > { %585 = vmatprep.subr.mxu0 %v256_v1  ;;  %599 = vmatpush3.msra.mxu1 %v368_v3  ;;  %s239_s11 = scalar_lea.vmem %s958_s0, %s542_s30  ;;  %v252_v10 = vld [vmem:[%s959_s1] sm:$0xff]  ;;  %v364_v11 = vld [vmem:[%s961_s3 + $0x58] sm:$0xff]  ;;  %v363_v13 = vld [vmem:[%s961_s3 + $0x50] sm:$0xff]  ;;  %p464_p11 = scmp.lt.s32.totalorder (%p806_p5), %s463_s23, 2 }
  0x17   : > { %586 = vmatpush3.msra.mxu0 %v256_v1  ;;  %600 = vmatprep.subr.mxu1 %v367_v4  ;;  %v250_v8 = vld [vmem:[%s239_s11] sm:$0xff]  ;;  %v251_v12 = vld [vmem:[%s239_s11 + $0x8] sm:$0xff]  ;;  %v360_v16 = vld [vmem:[%s961_s3 + $0x38] sm:$0xff] }
  0x18   : > { %587 = vmatprep.subr.mxu0 %v255_v2  ;;  %601 = vmatpush3.msra.mxu1 %v367_v4  ;;  %v362_v14 = vld [vmem:[%s961_s3 + $0x48] sm:$0xff]  ;;  %v361_v15 = vld [vmem:[%s961_s3 + $0x40] sm:$0xff]  ;;  %v359_v17 = vld [vmem:[%s961_s3 + $0x30] sm:$0xff] }
  0x19   : > { %588 = vmatpush3.msra.mxu0 %v255_v2  ;;  %602 = vmatprep.subr.mxu1 %v366_v6  ;;  %v358_v18 = vld [vmem:[%s961_s3 + $0x28] sm:$0xff]  ;;  %v357_v19 = vld [vmem:[%s961_s3 + $0x20] sm:$0xff]  ;;  %v356_v20 = vld [vmem:[%s961_s3 + $0x18] sm:$0xff] }
  0x1a   : > { %589 = vmatprep.subr.mxu0 %v254_v5  ;;  %595 = vmatprep.mubr.msk.f32.mxu0 %vm265_vm0, %v250_v8  ;;  %v355_v21 = vld [vmem:[%s961_s3 + $0x10] sm:$0xff]  ;;  %v354_v22 = vld [vmem:[%s961_s3 + $0x8] sm:$0xff]  ;;  %v353_v23 = vld [vmem:[%s961_s3] sm:$0xff] }
  0x1b   : > { %590 = vmatpush3.msra.mxu0 %v254_v5  ;;  %603 = vmatpush3.msra.mxu1 %v366_v6  ;;  %v543_v24 = vld [vmem:[%s960_s2] ss:$0 sm:$0xff] }
  0x1c   : > { %591 = vmatprep.subr.mxu0 %v253_v7  ;;  %604 = vmatprep.subr.mxu1 %v365_v9  ;;  %v546_v33 = vld [vmem:[%s962_s4] ss:$0 sm:$0xff] }
  0x1d   : > { %592 = vmatpush3.msra.mxu0 %v253_v7  ;;  %605 = vmatpush3.msra.mxu1 %v365_v9 }
  0x1e   : > { %593 = vmatprep.subr.mxu0 %v252_v10  ;;  %606 = vmatprep.subr.mxu1 %v364_v11 }
  0x1f   : > { %594 = vmatpush3.msra.mxu0 %v252_v10  ;;  %607 = vmatpush3.msra.mxu1 %v364_v11 }
  0x20   : > { %596 = vmatmul.mubr.msk.f32.vlgmr.msra.gmra.mxu0 %vm265_vm0, %v251_v12  ;;  %608 = vmatprep.subr.mxu1 %v363_v13 }
  0x21   : > { %609 = vmatpush3.msra.mxu1 %v363_v13 }
  0x22   : > { %610 = vmatprep.subr.mxu1 %v362_v14 }
  0x23   : > { %611 = vmatpush3.msra.mxu1 %v362_v14 }
  0x24   : > { %612 = vmatprep.subr.mxu1 %v361_v15 }
  0x25   : > { %613 = vmatpush3.msra.mxu1 %v361_v15 }
  0x26   : > { %614 = vmatprep.subr.mxu1 %v360_v16 }
  0x27   : > { %615 = vmatpush3.msra.mxu1 %v360_v16 }
  0x28   : > { %616 = vmatprep.subr.mxu1 %v359_v17 }
  0x29   : > { %617 = vmatpush3.msra.mxu1 %v359_v17 }
  0x2a   : > { %618 = vmatprep.subr.mxu1 %v358_v18 }
  0x2b   : > { %619 = vmatpush3.msra.mxu1 %v358_v18 }
  0x2c   : > { %620 = vmatprep.subr.mxu1 %v357_v19 }
  0x2d   : > { %621 = vmatpush3.msra.mxu1 %v357_v19 }
  0x2e   : > { %622 = vmatprep.subr.mxu1 %v356_v20 }
  0x2f   : > { %623 = vmatpush3.msra.mxu1 %v356_v20 }
  0x30   : > { %624 = vmatprep.subr.mxu1 %v355_v21 }
  0x31   : > { %625 = vmatpush3.msra.mxu1 %v355_v21 }
  0x32   : > { %626 = vmatprep.subr.mxu1 %v354_v22 }
  0x33   : > { %627 = vmatpush3.msra.mxu1 %v354_v22 }
  0x34   : > { %628 = vmatprep.subr.mxu1 %v353_v23 }
  0x35   : > { %629 = vmatpush3.msra.mxu1 %v353_v23 }
  0xe0   : > { %v597_v25 = vpop.f32.mrf.mxu0 }
  0xe1   : > { %v344_v26 = vadd.f32 %v597_v25, %v543_v24 }
  0xe2   : > { %v338_v27 = vpop.f32.mrf.mxu0 }
  0xe3   : > { %v339_v28 = vadd.f32 %v543_v24, %v338_v27  ;;  %v350_v29 = vmul.f32 0.1, %v344_v26  ;;  %vm348_vm2 = vcmp.ge.f32.partialorder %v344_v26, 0.0 }
  0xe5   : > { %vm347_vm1 = vcmp.ge.f32.partialorder %v339_v28, 0.0  ;;  %v349_v30 = vmul.f32 0.1, %v339_v28  ;;  %v352_v32 = vsel %vm348_vm2, %v344_v26, %v350_v29 }
  0xe7   : > { %v351_v31 = vsel %vm347_vm1, %v339_v28, %v349_v30 }
  0xe8   : > { %630 = vmatprep.mubr.f32.mxu1 %v351_v31 }
  0xe9   : > { %631 = vmatmul.mubr.f32.vlgmr.msra.gmra.mxu1 %v352_v32 }
 0x1a9   : > { %v632_v34 = vpop.f32.mrf.mxu1 }
 0x1aa   : > { %v448_v35 = vadd.f32 %v632_v34, %v546_v33  ;;  %461 = sbr.rel (!%p806_p5) target bundleno = 458 (0x1ca), region = 44 }
 0x1ab   : > { %v442_v36 = vpop.f32.mrf.mxu1 }
 0x1ac   : > { %453 = vst.msk [vmem:[%s230_s16 + $0x8] sm:$0xff] %vm451_vm3, %v448_v35  ;;  %v443_v37 = vadd.f32 %v546_v33, %v442_v36 }
 0x1ae   : > { %452 = vst.msk [vmem:[%s230_s16] sm:$0xff] %vm451_vm3, %v443_v37 }
 0x1af   : > { %s971_s23 = smov (!%p464_p11, %s463_s23), 2 }
 0x1b0   : > { %s904_s25 = sshll.u32 %s971_s23, 7 }
 0x1b1   : > { %s468_s26 = ssub.s32 256, %s904_s25 }
 0x1b2   : > { %469 = vsyncadd %s899_s17, %s468_s26  ;;  %p550_p12 = scmp.ne.s32.totalorder %s904_s25, 0  ;;  %s556_s30 = sshll.u32 %s789_s22, 8 }
 0x1b3   : > { %s913_s28 = scalar_lea.hbm %s963_s5, %s556_s30  ;;  %s474_s8 = sshll.u32 %s230_s16, 4  ;;  %s915_s8 = int_to_ptr.vmem [resolvable:$true] %s474_s8 }
 0x1b4   : > { %s673_s9 = scalar_lea.vmem %s915_s8, %s904_s25  ;;  %s735_s10 = smov [#allocation2]  }
 0x1b5   : > { %p674_p13 = scmp.ne.s32.totalorder %s915_s8, %s673_s9  ;;  %s677_s11 = sshll.u32 %s735_s10, 4  ;;  %s678_s11 = int_to_ptr.vmem [resolvable:$false] %s677_s11 }
 0x1b6   : > { %s679_s22 = scalar_lea.vmem %s678_s11, 512  ;;  %p680_p2 = scmp.lt.s32.totalorder %s915_s8, %s678_s11 }
 0x1b7   : > { %p675_p0 = pnand %p674_p13, %p550_p12  ;;  %p681_p3 = scmp.lt.s32.totalorder %s679_s22, %s673_s9 }
 0x1b9   : > { %p676_p1 = pneg %p675_p0  ;;  %p682_p4 = por %p681_p3, %p680_p2 }
 0x1bb   : > { %p683_p5 = pnand %p682_p4, %p676_p1 }
 0x1bd   : > { %686 = shalt.err (!%p683_p5)
}
 0x1be   : > { %s687_s12 = scalar_lea.hbm %s913_s28, %s904_s25  ;;  %s691_s15 = scalar_lea.hbm %s963_s5, 384 }
 0x1bf   : > { %p688_p7 = scmp.ne.s32.totalorder %s913_s28, %s687_s12  ;;  %p692_p10 = scmp.lt.s32.totalorder %s913_s28, %s963_s5 }
 0x1c0   : > { %p693_p11 = scmp.lt.s32.totalorder %s691_s15, %s687_s12 }
 0x1c1   : > { %p689_p8 = pnand %p688_p7, %p550_p12 }
 0x1c2   : > { %p694_p13 = por %p693_p11, %p692_p10 }
 0x1c3   : > { %p690_p9 = pneg %p689_p8 }
 0x1c5   : > { %p695_p0 = pnand %p694_p13, %p690_p9 }
 0x1c7   : > { %698 = shalt.err (!%p695_p0)
}
 0x1c8   : > { %s736_s26 = smov 128   ;;  %s737_s30 = smov 8  }
 0x1c9   : > { %480 = dma.vmem_to_hbm [thread:$0]  (%p550_p12), %s915_s8, %s904_s25, %s913_s28, %s899_s17, %s736_s26, %s736_s26, %s737_s30  }
 0x1ca PF: > { %p638_p1 = scmp.ge.s32.totalorder %s733_s21, 2  ;;  %s489_s6 = sand.u32 1, %s721_s18  }
 0x1cb   : > { %s490_s7 = scalar_lea.sflag [#allocation3], %s489_s6 }
 0x1cc   : > { %p635_p2 = pnand %p638_p1, %p810_p6 }
 0x1ce   : > { %p636_p3 = pneg %p635_p2 }
 0x1d0   : > { %716 = dma.done.wait (%p636_p3), %s490_s7, 256  }
 0x1d1   : > { %718 = vsyncadd (%p636_p3), %s490_s7, 4294967040  ;;  %p15_p4 = scmp.ge.s32.totalorder %s793_s24, 4   ;;  %s966_s18 = smov %s725_s19 }
 0x1d2   : > { %s967_s19 = smov %s729_s20  ;;  %s968_s20 = smov %s804_s27 }
 0x1d3   : > { %s969_s21 = smov %s793_s24  ;;  %17 = sbr.rel (!%p15_p4) target bundleno = 3 (0x3), region = 75 }
 0x1d8   :  { %495 = vsyncpa [#allocation3], 1 }
 0x1d9   :  { %497 = vsyncpa [#allocation3 + $0x1], 1 }

</bundles_post_ra>
